<compile_context>
chip_gen: v7x
topology: tpu7x:2x2x1
jax: 0.10.0
libtpu: 0.0.40
codegen_flags: <defaults>
</compile_context>

<pallas_src>
import functools

import jax
import jax.numpy as jnp
from jax.experimental import pallas as pl
from jax.experimental.pallas import tpu as pltpu


def actor_kernel(x_ref, w1_ref, b1_ref, w2_ref, b2_ref, w3_ref, b3_ref, out_ref,
                 *, num_actions):
    # Activations -> bf16 MXU operands with f32 accumulation; elementwise work in f32.
    x = x_ref[...].astype(jnp.bfloat16)

    # layer1 + ReLU
    h1 = jnp.dot(x, w1_ref[...], preferred_element_type=jnp.float32) + b1_ref[...]
    h1 = jnp.maximum(h1, 0.0)

    # layer2 + ReLU
    h2 = jnp.dot(h1.astype(jnp.bfloat16), w2_ref[...],
                 preferred_element_type=jnp.float32) + b2_ref[...]
    h2 = jnp.maximum(h2, 0.0)

    # layer3 -> lane-dense (128-padded) logits
    logits = jnp.dot(h2.astype(jnp.bfloat16), w3_ref[...],
                     preferred_element_type=jnp.float32) + b3_ref[...]

    # Mask padded action lanes with a large finite negative: exp underflows to 0.
    col = jax.lax.broadcasted_iota(jnp.int32, logits.shape, dimension=1)
    logits = jnp.where(col < num_actions, logits, -1e30)

    # Softmax over the action (lane) axis, all f32.  Exact division so every valid
    # row sums to 1 at f32 precision (Categorical consumers can build CDFs safely).
    m = jnp.max(logits, axis=-1, keepdims=True)
    e = jnp.exp(logits - m)
    denom = jnp.sum(e, axis=-1, keepdims=True)
    out_ref[...] = (e / denom).astype(out_ref.dtype)


def prepare_actor_params(params):
    """One-time preprocessing: pad layer3 to a lane-dense (multiple-of-128) action dim
    and cast matmul weights to bf16.  Call once at init, never per forward step."""
    w1, b1, w2, b2, w3, b3 = params
    num_actions = w3.shape[1]
    a_pad = pl.cdiv(num_actions, 128) * 128
    w3p = jnp.pad(w3, ((0, 0), (0, a_pad - num_actions)))
    b3p = jnp.pad(b3, ((0, 0), (0, a_pad - num_actions)))
    prepared = (w1.astype(jnp.bfloat16), b1.astype(jnp.float32),
                w2.astype(jnp.bfloat16), b2.astype(jnp.float32),
                w3p.astype(jnp.bfloat16), b3p.astype(jnp.float32))
    return prepared, num_actions


def actor_forward(x, prepared_params, num_actions, *, tile_b=512,
                  out_dtype=jnp.float32, single_buffer_weights=False):
    w1, b1, w2, b2, w3, b3 = prepared_params
    B, S = x.shape
    H = w1.shape[1]
    A_pad = w3.shape[1]

    # Batch tiling: multiple of 8 (f32 sublane).  Clamp so batches >= 16 give at least
    # two grid steps (second v7x TensorCore); tiny batches collapse to one 8-row tile.
    tile_b = max(8, min(tile_b, pl.cdiv(pl.cdiv(B, 2), 8) * 8))
    grid = (pl.cdiv(B, tile_b),)

    # Grid-invariant (VMEM-resident) weight/bias specs; optionally single-buffered.
    if single_buffer_weights:
        def resident(shape):
            return pl.BlockSpec(shape, lambda i: (0, 0), pipeline_mode=pl.Buffered(1))
    else:
        def resident(shape):
            return pl.BlockSpec(shape, lambda i: (0, 0))

    out_itemsize = jnp.dtype(out_dtype).itemsize
    flops = 2 * B * (S * H + H * H + H * A_pad)
    bytes_accessed = (4 * B * S + out_itemsize * B * A_pad        # x in, probs out
                      + 2 * (S * H + H * H + H * A_pad)           # bf16 weights
                      + 4 * (H + H + A_pad))                      # f32 biases

    # Explicit VMEM budget: weights x buffer_count + double-buffered x/out tiles +
    # f32 intermediates, with 2x headroom.  Clamped to 64 MiB (v7x physical VMEM).
    weight_buffers = 1 if single_buffer_weights else 2
    weight_bytes = 2 * (S * H + H * H + H * A_pad) + 4 * (2 * H + A_pad)
    tile_bytes = 2 * tile_b * (4 * S + out_itemsize * A_pad)
    act_bytes = 4 * tile_b * (2 * H + A_pad)
    needed = weight_buffers * weight_bytes + tile_bytes + act_bytes
    vmem_limit = int(min(64 << 20, max(32 << 20, 2 * needed)))

    kernel = functools.partial(actor_kernel, num_actions=num_actions)

    out = pl.pallas_call(
        kernel,
        out_shape=jax.ShapeDtypeStruct((B, A_pad), out_dtype),
        grid=grid,
        in_specs=[
            pl.BlockSpec((tile_b, S), lambda i: (i, 0)),   # x: tiled over batch
            resident((S, H)),                              # w1
            resident((1, H)),                              # b1
            resident((H, H)),                              # w2
            resident((1, H)),                              # b2
            resident((H, A_pad)),                          # w3 (lane-padded)
            resident((1, A_pad)),                          # b3 (lane-padded)
        ],
        out_specs=pl.BlockSpec((tile_b, A_pad), lambda i: (i, 0)),
        compiler_params=pltpu.CompilerParams(
            dimension_semantics=("parallel",),
            vmem_limit_bytes=vmem_limit),
        cost_estimate=pl.CostEstimate(
            flops=flops,
            transcendentals=B * A_pad,
            bytes_accessed=bytes_accessed),
    )(x, w1, b1, w2, b2, w3, b3)

    return out[:, :num_actions]


def init_actor_params(key, number_of_state, number_of_action, hidden_size):
    # Deterministic init mimicking torch.nn.Linear default (uniform +-1/sqrt(fan_in)).
    def linear(k, fan_in, fan_out):
        k_w, k_b = jax.random.split(k)
        bound = 1.0 / jnp.sqrt(jnp.float32(fan_in))
        w = jax.random.uniform(k_w, (fan_in, fan_out), jnp.float32, -bound, bound)
        b = jax.random.uniform(k_b, (1, fan_out), jnp.float32, -bound, bound)
        return w, b

    k1, k2, k3 = jax.random.split(key, 3)
    w1, b1 = linear(k1, number_of_state, hidden_size)
    w2, b2 = linear(k2, hidden_size, hidden_size)
    w3, b3 = linear(k3, hidden_size, number_of_action)
    return (w1, b1, w2, b2, w3, b3)


def actor_reference(x, params):
    # Pure-JAX f32 reference of Actor.forward.
    w1, b1, w2, b2, w3, b3 = params
    h1 = jax.nn.relu(x @ w1 + b1)
    h2 = jax.nn.relu(h1 @ w2 + b2)
    return jax.nn.softmax(h2 @ w3 + b3, axis=1)


# TODO(synk): getActionAndProb (Categorical sampling + log_prob) is host-side control
# flow and stays outside the kernel; only the forward pass is implemented here.

if __name__ == "__main__":
    number_of_state = 4
    number_of_action = 6
    hidden_size = 32
    batch = 2

    key = jax.random.PRNGKey(0)
    k_params, k_x = jax.random.split(key)
    params = init_actor_params(k_params, number_of_state, number_of_action, hidden_size)
    prepared, num_actions = prepare_actor_params(params)   # one-time: pad + bf16 cast
    x = jax.random.normal(k_x, (batch, number_of_state), jnp.float32)

    probs = jax.block_until_ready(actor_forward(x, prepared, num_actions))
    ref = actor_reference(x, params)

    assert probs.shape == (batch, number_of_action)
    assert bool(jnp.all(jnp.isfinite(probs)))
    # Exact-division f32 softmax: rows sum to 1 to ~1e-6.
    assert jnp.allclose(jnp.sum(probs, axis=1), 1.0, atol=1e-4)
    # bf16 MXU operands vs f32 reference -> loosened tolerance.
    assert jnp.allclose(probs, ref, atol=1e-2, rtol=5e-2)
    print("KERNEL_OK")
</pallas_src>

<mosaic_0001>
module attributes {stable_mosaic.version = 11 : i64} {
  func.func @actor_kernel(%arg0: i32, %arg1: memref<8x4xf32, #tpu.memory_space<vmem>>, %arg2: memref<4x32xbf16, #tpu.memory_space<vmem>>, %arg3: memref<1x32xf32, #tpu.memory_space<vmem>>, %arg4: memref<32x32xbf16, #tpu.memory_space<vmem>>, %arg5: memref<1x32xf32, #tpu.memory_space<vmem>>, %arg6: memref<32x128xbf16, #tpu.memory_space<vmem>>, %arg7: memref<1x128xf32, #tpu.memory_space<vmem>>, %arg8: memref<8x128xf32, #tpu.memory_space<vmem>>) attributes {dimension_semantics = [#tpu.dimension_semantics<parallel>], iteration_bounds = array<i64: 1>, scalar_prefetch = 0 : i64, scratch_operands = 0 : i64, tpu.core_type = #tpu.core_type<tc>, window_params = [{transform_indices = @transform_0, window_bounds = array<i64: 8, 4>}, {pipeline_mode = #tpu.pipeline_mode<synchronous>, transform_indices = @transform_1, window_bounds = array<i64: 4, 32>}, {pipeline_mode = #tpu.pipeline_mode<synchronous>, transform_indices = @transform_2, window_bounds = array<i64: 1, 32>}, {pipeline_mode = #tpu.pipeline_mode<synchronous>, transform_indices = @transform_3, window_bounds = array<i64: 32, 32>}, {pipeline_mode = #tpu.pipeline_mode<synchronous>, transform_indices = @transform_4, window_bounds = array<i64: 1, 32>}, {pipeline_mode = #tpu.pipeline_mode<synchronous>, transform_indices = @transform_5, window_bounds = array<i64: 32, 128>}, {pipeline_mode = #tpu.pipeline_mode<synchronous>, transform_indices = @transform_6, window_bounds = array<i64: 1, 128>}, {transform_indices = @transform_7, window_bounds = array<i64: 8, 128>}]} {
    %c0 = arith.constant 0 : index
    %c0_0 = arith.constant 0 : index
    %0 = vector.load %arg1[%c0, %c0_0] : memref<8x4xf32, #tpu.memory_space<vmem>>, vector<8x4xf32>
    %1 = arith.truncf %0 : vector<8x4xf32> to vector<8x4xbf16>
    %c0_1 = arith.constant 0 : index
    %c0_2 = arith.constant 0 : index
    %2 = vector.load %arg2[%c0_1, %c0_2] : memref<4x32xbf16, #tpu.memory_space<vmem>>, vector<4x32xbf16>
    %cst = arith.constant dense<0.000000e+00> : vector<8x32xf32>
    %3 = tpu.matmul %1, %2, %cst {dimension_numbers = #tpu.dot_dimension_numbers<[1], [0], [0], [1], [0, 0, 1, 1], [], []>} : vector<8x4xbf16>, vector<4x32xbf16>, vector<8x32xf32> -> vector<8x32xf32>
    %c0_3 = arith.constant 0 : index
    %c0_4 = arith.constant 0 : index
    %4 = vector.load %arg3[%c0_3, %c0_4] : memref<1x32xf32, #tpu.memory_space<vmem>>, vector<1x32xf32>
    %5 = vector.broadcast %4 : vector<1x32xf32> to vector<8x32xf32>
    %6 = arith.addf %3, %5 : vector<8x32xf32>
    %cst_5 = arith.constant 0.000000e+00 : f32
    %7 = vector.broadcast %cst_5 : f32 to vector<8x32xf32>
    %8 = arith.maximumf %6, %7 : vector<8x32xf32>
    %9 = arith.truncf %8 : vector<8x32xf32> to vector<8x32xbf16>
    %c0_6 = arith.constant 0 : index
    %c0_7 = arith.constant 0 : index
    %10 = vector.load %arg4[%c0_6, %c0_7] : memref<32x32xbf16, #tpu.memory_space<vmem>>, vector<32x32xbf16>
    %cst_8 = arith.constant dense<0.000000e+00> : vector<8x32xf32>
    %11 = tpu.matmul %9, %10, %cst_8 {dimension_numbers = #tpu.dot_dimension_numbers<[1], [0], [0], [1], [0, 0, 1, 1], [], []>} : vector<8x32xbf16>, vector<32x32xbf16>, vector<8x32xf32> -> vector<8x32xf32>
    %c0_9 = arith.constant 0 : index
    %c0_10 = arith.constant 0 : index
    %12 = vector.load %arg5[%c0_9, %c0_10] : memref<1x32xf32, #tpu.memory_space<vmem>>, vector<1x32xf32>
    %13 = vector.broadcast %12 : vector<1x32xf32> to vector<8x32xf32>
    %14 = arith.addf %11, %13 : vector<8x32xf32>
    %cst_11 = arith.constant 0.000000e+00 : f32
    %15 = vector.broadcast %cst_11 : f32 to vector<8x32xf32>
    %16 = arith.maximumf %14, %15 : vector<8x32xf32>
    %17 = arith.truncf %16 : vector<8x32xf32> to vector<8x32xbf16>
    %c0_12 = arith.constant 0 : index
    %c0_13 = arith.constant 0 : index
    %18 = vector.load %arg6[%c0_12, %c0_13] : memref<32x128xbf16, #tpu.memory_space<vmem>>, vector<32x128xbf16>
    %cst_14 = arith.constant dense<0.000000e+00> : vector<8x128xf32>
    %19 = tpu.matmul %17, %18, %cst_14 {dimension_numbers = #tpu.dot_dimension_numbers<[1], [0], [0], [1], [0, 0, 1, 1], [], []>} : vector<8x32xbf16>, vector<32x128xbf16>, vector<8x128xf32> -> vector<8x128xf32>
    %c0_15 = arith.constant 0 : index
    %c0_16 = arith.constant 0 : index
    %20 = vector.load %arg7[%c0_15, %c0_16] : memref<1x128xf32, #tpu.memory_space<vmem>>, vector<1x128xf32>
    %21 = vector.broadcast %20 : vector<1x128xf32> to vector<8x128xf32>
    %22 = arith.addf %19, %21 : vector<8x128xf32>
    %23 = tpu.iota {dimensions = array<i32: 1>} : vector<8x128xi32>
    %c6_i32 = arith.constant 6 : i32
    %24 = vector.broadcast %c6_i32 : i32 to vector<8x128xi32>
    %25 = arith.cmpi slt, %23, %24 : vector<8x128xi32>
    %cst_17 = arith.constant -1.000000e+30 : f32
    %26 = vector.broadcast %cst_17 : f32 to vector<8x128xf32>
    %27 = arith.select %25, %22, %26 : vector<8x128xi1>, vector<8x128xf32>
    %cst_18 = arith.constant dense<0xFF800000> : vector<8xf32>
    %28 = vector.multi_reduction <maximumf>, %27, %cst_18 [1] : vector<8x128xf32> to vector<8xf32>
    %29 = vector.shape_cast %28 : vector<8xf32> to vector<8x1xf32>
    %30 = vector.broadcast %29 : vector<8x1xf32> to vector<8x128xf32>
    %31 = arith.subf %27, %30 : vector<8x128xf32>
    %32 = math.exp %31 : vector<8x128xf32>
    %cst_19 = arith.constant dense<0.000000e+00> : vector<8xf32>
    %33 = vector.multi_reduction <add>, %32, %cst_19 [1] : vector<8x128xf32> to vector<8xf32>
    %34 = vector.shape_cast %33 : vector<8xf32> to vector<8x1xf32>
    %35 = vector.broadcast %34 : vector<8x1xf32> to vector<8x128xf32>
    %36 = arith.divf %32, %35 : vector<8x128xf32>
    %c0_20 = arith.constant 0 : index
    %c0_21 = arith.constant 0 : index
    %37 = vector.load %arg8[%c0_20, %c0_21] : memref<8x128xf32, #tpu.memory_space<vmem>>, vector<8x128xf32>
    tpu.vector_store %arg8[%c0_20, %c0_21], %36 {strides = array<i32>} : memref<8x128xf32, #tpu.memory_space<vmem>>, vector<8x128xf32>,
    return
  }
  func.func @transform_0(%arg0: i32) -> (i32, i32) {
    %c0_i32 = arith.constant 0 : i32
    %c0_i32_0 = arith.constant 0 : i32
    return %arg0, %c0_i32 : i32, i32
  }
  func.func @transform_1(%arg0: i32) -> (i32, i32) {
    %c0_i32 = arith.constant 0 : i32
    %c0_i32_0 = arith.constant 0 : i32
    %c0_i32_1 = arith.constant 0 : i32
    return %c0_i32, %c0_i32_0 : i32, i32
  }
  func.func @transform_2(%arg0: i32) -> (i32, i32) {
    %c0_i32 = arith.constant 0 : i32
    %c0_i32_0 = arith.constant 0 : i32
    %c0_i32_1 = arith.constant 0 : i32
    return %c0_i32, %c0_i32_0 : i32, i32
  }
  func.func @transform_3(%arg0: i32) -> (i32, i32) {
    %c0_i32 = arith.constant 0 : i32
    %c0_i32_0 = arith.constant 0 : i32
    %c0_i32_1 = arith.constant 0 : i32
    return %c0_i32, %c0_i32_0 : i32, i32
  }
  func.func @transform_4(%arg0: i32) -> (i32, i32) {
    %c0_i32 = arith.constant 0 : i32
    %c0_i32_0 = arith.constant 0 : i32
    %c0_i32_1 = arith.constant 0 : i32
    return %c0_i32, %c0_i32_0 : i32, i32
  }
  func.func @transform_5(%arg0: i32) -> (i32, i32) {
    %c0_i32 = arith.constant 0 : i32
    %c0_i32_0 = arith.constant 0 : i32
    %c0_i32_1 = arith.constant 0 : i32
    return %c0_i32, %c0_i32_0 : i32, i32
  }
  func.func @transform_6(%arg0: i32) -> (i32, i32) {
    %c0_i32 = arith.constant 0 : i32
    %c0_i32_0 = arith.constant 0 : i32
    %c0_i32_1 = arith.constant 0 : i32
    return %c0_i32, %c0_i32_0 : i32, i32
  }
  func.func @transform_7(%arg0: i32) -> (i32, i32) {
    %c0_i32 = arith.constant 0 : i32
    %c0_i32_0 = arith.constant 0 : i32
    return %arg0, %c0_i32 : i32, i32
  }
}

</mosaic_0001>

<bundles_post_ra>
// kernel: tpu_custom_call.1
= control target key start
LH: loop header
LB: loop body
LE: loop exit
PB: predicated region body
PF: predicated region fallthrough
CT: control target
= control target key end

     0   :  { %12 = vsyncpa [#allocation3], 0  ;;  %s621_s0 = inlined_call_operand.hbm [shape: f32[2,4], index: 0, kind: input, shape index: {}]   ;;  %s622_s1 = inlined_call_operand.vmem [shape: bf16[4,32], index: 1, kind: input, shape index: {}]   ;;  %s623_s2 = inlined_call_operand.hbm [shape: f32[1,32], index: 2, kind: input, shape index: {}]   ;;  %s624_s3 = inlined_call_operand.hbm [shape: bf16[32,32], index: 3, kind: input, shape index: {}]   ;;  %s625_s4 = inlined_call_operand.hbm [shape: f32[1,32], index: 4, kind: input, shape index: {}]   ;;  %s626_s5 = inlined_call_operand.vmem [shape: bf16[32,128], index: 5, kind: input, shape index: {}]   ;;  %s627_s6 = inlined_call_operand.vmem [shape: f32[1,128], index: 6, kind: input, shape index: {}]   ;;  %s628_s7 = inlined_call_operand.hbm [shape: f32[2,128], index: 7, kind: output, shape index: {}]  }
   0x1   :  { %13 = vsyncpa [#allocation6], 0 }
   0x2   :  { %14 = vsyncpa [#allocation9], 0 }
   0x3   :  { %15 = vsyncpa [#allocation4], 0 }
   0x4   :  { %20 = vsyncadd [#allocation3], 96  ;;  %s484_s24 = smov [#allocation5]   ;;  %s485_s26 = smov [#allocation2]  }
   0x5   :  { %s36_s25 = sshll.u32 %s484_s24, 4  ;;  %s21_s27 = sshll.u32 %s485_s26, 4  ;;  %s37_s25 = int_to_ptr.vmem [resolvable:$true] %s36_s25  ;;  %s535_s27 = int_to_ptr.vmem [resolvable:$true] %s21_s27 }
   0x6   :  { %s366_s30 = scalar_lea.hbm %s623_s2, 16 }
   0x7   :  { %p367_p0 = scmp.ne.s32.totalorder %s623_s2, %s366_s30  ;;  %p370_p1 = scmp.lt.u32.totalorder %s366_s30, %s623_s2 }
   0x9   :  { %p372_p2 = pnand %p370_p1, %p367_p0 }
   0xb   :  { %375 = shalt.err (!%p372_p2)
}
   0xc   :  { %s376_s12 = scalar_lea.vmem %s37_s25, 16  ;;  %s380_s13 = scalar_lea.vmem %s37_s25, 32 }
   0xd   :  { %p377_p3 = scmp.ne.s32.totalorder %s37_s25, %s376_s12  ;;  %p381_p4 = scmp.lt.s32.totalorder %s37_s25, %s37_s25 }
   0xe   :  { %p382_p5 = scmp.lt.s32.totalorder %s380_s13, %s376_s12 }
  0x10   :  { %p383_p6 = por %p382_p5, %p381_p4 }
  0x12   :  { %p384_p7 = pnand %p383_p6, %p377_p3 }
  0x14   :  { %387 = shalt.err (!%p384_p7)
}
  0x15   :  { %39 = dma.hbm_to_vmem [thread:$0]  %s623_s2, 16, %s37_s25, [#allocation6]  }
  0x16   :  { %s388_s18 = scalar_lea.hbm %s621_s0, 32 }
  0x17   :  { %p389_p8 = scmp.ne.s32.totalorder %s621_s0, %s388_s18  ;;  %p392_p9 = scmp.lt.u32.totalorder %s388_s18, %s621_s0 }
  0x19   :  { %p394_p10 = pnand %p392_p9, %p389_p8 }
  0x1b   :  { %397 = shalt.err (!%p394_p10)
}
  0x1c   :  { %s398_s23 = scalar_lea.vmem %s535_s27, 32  ;;  %s402_s2 = scalar_lea.vmem %s535_s27, 128 }
  0x1d   :  { %p399_p11 = scmp.ne.s32.totalorder %s535_s27, %s398_s23  ;;  %p403_p12 = scmp.lt.s32.totalorder %s535_s27, %s535_s27 }
  0x1e   :  { %p404_p13 = scmp.lt.s32.totalorder %s402_s2, %s398_s23 }
  0x20   :  { %p405_p0 = por %p404_p13, %p403_p12 }
  0x22   :  { %p406_p1 = pnand %p405_p0, %p399_p11 }
  0x24   :  { %409 = shalt.err (!%p406_p1)
}
  0x25   :  { %s486_s24 = smov 32   ;;  %s487_s25 = smov 2  }
  0x26   :  { %27 = dma.hbm_to_vmem [thread:$0]  %s621_s0, 32, %s535_s27, [#allocation3], %s486_s24, %s486_s24, %s487_s25  }
  0x27   :  { %s488_s29 = smov [#allocation7]   ;;  %s410_s10 = scalar_lea.hbm %s624_s3, 256 }
  0x28   :  { %s45_s30 = sshll.u32 %s488_s29, 4  ;;  %p411_p2 = scmp.ne.s32.totalorder %s624_s3, %s410_s10  ;;  %s46_s30 = int_to_ptr.vmem [resolvable:$true] %s45_s30 }
  0x29   :  { %p414_p3 = scmp.lt.u32.totalorder %s410_s10, %s624_s3 }
  0x2b   :  { %p416_p4 = pnand %p414_p3, %p411_p2 }
  0x2d   :  { %419 = shalt.err (!%p416_p4)
}
  0x2e   :  { %s420_s15 = scalar_lea.vmem %s46_s30, 256  ;;  %p425_p6 = scmp.lt.s32.totalorder %s46_s30, %s46_s30 }
  0x2f   :  { %p421_p5 = scmp.ne.s32.totalorder %s46_s30, %s420_s15  ;;  %p426_p7 = scmp.lt.s32.totalorder %s420_s15, %s420_s15 }
  0x31   :  { %p427_p8 = por %p426_p7, %p425_p6 }
  0x33   :  { %p428_p9 = pnand %p427_p8, %p421_p5 }
  0x35   :  { %431 = shalt.err (!%p428_p9)
}
  0x36   :  { %s489_s0 = smov 64   ;;  %s490_s27 = smov 4  }
  0x37   :  { %51 = dma.hbm_to_vmem [thread:$0]  %s624_s3, 256, %s46_s30, [#allocation6], %s489_s0, %s489_s0, %s490_s27  }
  0x38   :  { %s491_s18 = smov [#allocation8]   ;;  %s432_s22 = scalar_lea.hbm %s625_s4, 16 }
  0x39   :  { %s58_s19 = sshll.u32 %s491_s18, 4  ;;  %p433_p10 = scmp.ne.s32.totalorder %s625_s4, %s432_s22  ;;  %s59_s19 = int_to_ptr.vmem [resolvable:$true] %s58_s19 }
  0x3a   :  { %p436_p11 = scmp.lt.u32.totalorder %s432_s22, %s625_s4 }
  0x3c   :  { %p438_p12 = pnand %p436_p11, %p433_p10 }
  0x3e   :  { %441 = shalt.err (!%p438_p12)
}
  0x3f   :  { %s442_s29 = scalar_lea.vmem %s59_s19, 16  ;;  %s446_s3 = scalar_lea.vmem %s59_s19, 32 }
  0x40   :  { %p443_p13 = scmp.ne.s32.totalorder %s59_s19, %s442_s29  ;;  %p447_p0 = scmp.lt.s32.totalorder %s59_s19, %s59_s19 }
  0x41   :  { %p448_p1 = scmp.lt.s32.totalorder %s446_s3, %s442_s29 }
  0x43   :  { %p449_p2 = por %p448_p1, %p447_p0 }
  0x45   :  { %p450_p3 = pnand %p449_p2, %p443_p13 }
  0x47   :  { %453 = shalt.err (!%p450_p3)
}
  0x48   :  { %61 = dma.hbm_to_vmem [thread:$0]  %s625_s4, 16, %s59_s19, [#allocation9]  }
  0x49   :  { %476 = dma.done.wait [#allocation3], 128  }
  0x4a   :  { %477 = vsyncadd [#allocation3], 4294967168 }
  0x4b   :  { %478 = dma.done.wait [#allocation6], 272  }
  0x4c   :  { %479 = vsyncadd [#allocation6], 4294967024 }
  0x4d   :  { %480 = dma.done.wait [#allocation9], 16  }
  0x4e   :  { %481 = vsyncadd [#allocation9], 4294967280  ;;  %v492_v0 = vmov 0.0   ;;  %vm493_vm0 = vmmov 0   ;;  %vm93_vm1 = vcmask 1041408   ;;  %v79_v2 = vld [vmem:[#allocation2] sm:$0xff]  ;;  %v274_v25 = vlaneseq }
  0x4f   :  { %325 = vmatprep.subr.bf16.mxu0 %v492_v0  ;;  %327 = vmatprep.mubr.msk.bf16.mxu0 %vm493_vm0, %v492_v0  ;;  %v81_v1 = vld [vmem:[%s622_s1] sm:$0x3]  ;;  %v80_v4 = vpack.c.bf16 %v79_v2, %v79_v2  ;;  %vm89_vm2 = vcmask 31744   ;;  %v359_v6 = vld [vmem:[#allocation7 + $0x8] sm:$0xff]   ;;  %v307_v8 = vld [vmem:[#allocation5] ss:$0 sm:$0xff] }
  0x50   :  { %331 = vmatprep.subr.bf16.mxu1 %v492_v0  ;;  %335 = vmatprep.mubr.msk.bf16.mxu1 %vm493_vm0, %v492_v0  ;;  %v95_v3 = vsel %vm93_vm1, %v81_v1, 0  ;;  %v358_v5 = vld [vmem:[#allocation7] sm:$0xff]   ;;  %vm162_vm3 = vcmask 261120   ;;  %v361_v16 = vld [vmem:[%s626_s5 + $0x8] sm:$0xff]   ;;  %v275_v26 = vand.u32 127, %v274_v25 }
  0x51   :  { %326 = vmatpush3.bf16.msra.mxu0 %v95_v3  ;;  %332 = vmatpush3.bf16.msra.mxu1 %v358_v5  ;;  %v360_v7 = vld [vmem:[%s626_s5] sm:$0xff]   ;;  %v309_v17 = vld [vmem:[#allocation8] ss:$0 sm:$0xff] }
  0x52   :  { %339 = vmatprep.subr.bf16.mxu0 %v492_v0  ;;  %333 = vmatprep.subr.bf16.mxu1 %v492_v0  ;;  %v313_v27 = vld [vmem:[%s627_s6] ss:$0 sm:$0xff]  ;;  %vm276_vm4 = vcmp.lt.s32.totalorder %v275_v26, 6 }
  0x54   :  { %328 = vmatmul.mubr.msk.bf16.vlgmr.msra.gmra.mrb[0].mxu0 %vm89_vm2, %v80_v4 }
  0x55   :  { %343 = vmatprep.mubr.msk.bf16.mxu0 %vm493_vm0, %v492_v0  ;;  %334 = vmatpush3.bf16.msra.mxu1 %v359_v6 }
  0x56   :  { %340 = vmatpush3.bf16.msra.mxu0 %v360_v7 }
  0x57   :  { %341 = vmatprep.subr.bf16.mxu0 %v492_v0 }
  0x5a   :  { %342 = vmatpush3.bf16.msra.mxu0 %v361_v16 }
 0x127   :  { %v131_v9 = vpop.f32.mrb[0].mxu0 }
 0x128   :  { %v132_v10 = vadd.f32 %v307_v8, %v131_v9  ;;  %v329_v11 = vpop.f32.mrb[1].mxu0 }
 0x129   :  { %v134_v12 = vpop.f32.mrb[2].mxu0 }
 0x12a   :  { %v137_v13 = vmax.f32 %v132_v10, 0.0  ;;  %v330_v14 = vpop.f32.mrb[3].mxu0 }
 0x12c   :  { %v138_v15 = vpack.c.bf16 %v137_v13, %v137_v13 }
 0x12e   :  { %336 = vmatmul.mubr.msk.bf16.vlgmr.msra.gmra.mrb[0].mxu1 %vm162_vm3, %v138_v15 }
 0x201   :  { %v200_v18 = vpop.f32.mrb[0].mxu1 }
 0x202   :  { %v201_v19 = vadd.f32 %v309_v17, %v200_v18  ;;  %v337_v20 = vpop.f32.mrb[1].mxu1 }
 0x203   :  { %v203_v21 = vpop.f32.mrb[2].mxu1 }
 0x204   :  { %v206_v22 = vmax.f32 %v201_v19, 0.0  ;;  %v338_v23 = vpop.f32.mrb[3].mxu1 }
 0x206   :  { %v207_v24 = vpack.c.bf16 %v206_v22, %v206_v22 }
 0x208   :  { %344 = vmatmul.mubr.msk.bf16.vlgmr.msra.gmra.mrb[4].mxu0 %vm162_vm3, %v207_v24 }
 0x2db   :  { %v268_v28 = vpop.f32.mrb[4].mxu0 }
 0x2dc   :  { %v269_v29 = vadd.f32 %v313_v27, %v268_v28  ;;  %v345_v30 = vpop.f32.mrb[5].mxu0 }
 0x2dd   :  { %v271_v31 = vpop.f32.mrb[6].mxu0 }
 0x2de   :  { %v346_v32 = vpop.f32.mrb[7].mxu0  ;;  %v277_v33 = vsel %vm276_vm4, %v269_v29, -1e+30 }
 0x2df   :  { %278 = vmax.xlane.f32.xlu0 %v277_v33 }
 0x36c   :  { %v279_v34 = vpop.xlane.xlu0 %278 }
 0x36d   :  { %v280_v35 = vsub.f32 %v277_v33, %v279_v34 }
 0x36f   :  { %v281_v36 = vmul.f32 1.442695, %v280_v35 }
 0x371   :  { %362 = vpow2.f32 %v281_v36 }
 0x37b   :  { %v363_v37 = vpop.eup %362 }
 0x37c   :  { %283 = vadd.xlane.f32.xlu0 %v363_v37 }
 0x409   :  { %v284_v38 = vpop.xlane.xlu0 %283 }
 0x40a   :  { %364 = vrcp.f32 %v284_v38 }
 0x414   :  { %v365_v39 = vpop.eup %364 }
 0x415   :  { %v286_v40 = vmul.f32 %v365_v39, %v363_v37 }
 0x417   :  { %287 = vst [vmem:[#allocation10] sm:$0xff] %v286_v40 }
 0x418   :  { %292 = vsyncadd [#allocation4], 96  ;;  %s494_s5 = smov [#allocation10]  }
 0x419   :  { %s293_s6 = sshll.u32 %s494_s5, 4  ;;  %s294_s6 = int_to_ptr.vmem [resolvable:$true] %s293_s6 }
 0x41a   :  { %s454_s15 = scalar_lea.vmem %s294_s6, 32  ;;  %s458_s0 = scalar_lea.vmem %s294_s6, 128 }
 0x41b   :  { %p455_p4 = scmp.ne.s32.totalorder %s294_s6, %s454_s15  ;;  %p459_p5 = scmp.lt.s32.totalorder %s294_s6, %s294_s6 }
 0x41c   :  { %p460_p6 = scmp.lt.s32.totalorder %s458_s0, %s454_s15 }
 0x41e   :  { %p461_p7 = por %p460_p6, %p459_p5 }
 0x420   :  { %p462_p8 = pnand %p461_p7, %p455_p4 }
 0x422   :  { %465 = shalt.err (!%p462_p8)
}
 0x423   :  { %s466_s17 = scalar_lea.hbm %s628_s7, 32 }
 0x424   :  { %p467_p9 = scmp.ne.s32.totalorder %s628_s7, %s466_s17  ;;  %p470_p10 = scmp.lt.u32.totalorder %s466_s17, %s628_s7 }
 0x426   :  { %p472_p11 = pnand %p470_p10, %p467_p9 }
 0x428   :  { %475 = shalt.err (!%p472_p11)
}
 0x429   :  { %299 = dma.vmem_to_hbm [thread:$0]  %s294_s6, 32, %s628_s7, [#allocation4], %s486_s24, %s486_s24, %s487_s25  }
 0x42a   :  { %482 = dma.done.wait [#allocation4], 128  }
 0x42b   :  { %483 = vsyncadd [#allocation4], 4294967168 }
 0x42c   :  { %303 = vsyncpa [#allocation3], 1 }
 0x42d   :  { %304 = vsyncpa [#allocation6], 1 }
 0x42e   :  { %305 = vsyncpa [#allocation9], 1 }
 0x42f   :  { %306 = vsyncpa [#allocation4], 1 }

</bundles_post_ra>
